<compile_context>
chip_gen: v7x
topology: tpu7x:2x2x1
jax: 0.10.0
libtpu: 0.0.40
codegen_flags: <defaults>
</compile_context>

<pallas_src>
import functools

import jax
import jax.numpy as jnp
import numpy as np
from jax.experimental import pallas as pl
from jax.experimental.pallas import tpu as pltpu

_VMEM_LIMIT_BYTES = 32 * 1024 * 1024   # safe on v5e/v6e (128 MiB) and v7x (64 MiB)
_FORCE_BLOCK_BYTES = None              # test hook: override the per-block budget


def _round_up(x, m):
    return ((x + m - 1) // m) * m


def _cdiv(a, b):
    return -(-a // b)


def _block_bytes():
    """Per-input-block budget (double-buffered by the pipeline)."""
    if _FORCE_BLOCK_BYTES is not None:
        return int(_FORCE_BLOCK_BYTES)
    try:
        kind = jax.devices()[0].device_kind.lower()
    except Exception:  # pragma: no cover - defensive
        kind = ""
    if "v7" in kind:
        return 8 * 1024 * 1024   # 3.2 TB/s HBM -> amortize per-step overhead
    if "v6" in kind:
        return 6 * 1024 * 1024
    return 4 * 1024 * 1024       # v5e and unknown: stay comfortably inside VMEM


# --------------------------------------------------------------------------
# Kernels
# --------------------------------------------------------------------------
def _mean_last_single_kernel(x_ref, o_ref, *, inv_k):
    """x_ref: (TP, K). Whole reduce axis in one block -> no accumulator needed."""
    x = x_ref[...].astype(jnp.float32)
    o_ref[...] = (jnp.sum(x, axis=-1, keepdims=True) * inv_k).astype(o_ref.dtype)


def _mean_last_acc_kernel(x_ref, o_ref, acc_ref, *, inv_k, rem):
    """x_ref: (TP, TK). Reduce the lane axis across grid axis 1 into acc_ref."""
    k = pl.program_id(1)
    nk = pl.num_programs(1)

    @pl.when(k == 0)
    def _():
        acc_ref[...] = jnp.zeros_like(acc_ref)

    x = x_ref[...].astype(jnp.float32)
    if rem:  # mask the padded tail of the reduction axis (static compile-time flag)
        valid = jnp.where(k == nk - 1, rem, x.shape[-1])
        lane = jax.lax.broadcasted_iota(jnp.int32, x.shape, 1)
        x = jnp.where(lane < valid, x, 0.0)
    acc_ref[...] += jnp.sum(x, axis=-1, keepdims=True)

    @pl.when(k == nk - 1)
    def _():
        o_ref[...] = (acc_ref[...] * inv_k).astype(o_ref.dtype)


def _mean_mid_single_kernel(x_ref, o_ref, *, inv_k):
    """x_ref: (TP, K, TQ). Whole reduce axis in one block -> direct write."""
    x = x_ref[...].astype(jnp.float32)
    o_ref[...] = (jnp.sum(x, axis=1, keepdims=True) * inv_k).astype(o_ref.dtype)


def _mean_mid_acc_kernel(x_ref, o_ref, acc_ref, *, inv_k, rem):
    """x_ref: (TP, TK, TQ). Reduce the sublane axis across grid axis 2."""
    k = pl.program_id(2)
    nk = pl.num_programs(2)

    @pl.when(k == 0)
    def _():
        acc_ref[...] = jnp.zeros_like(acc_ref)

    x = x_ref[...].astype(jnp.float32)
    if rem:
        valid = jnp.where(k == nk - 1, rem, x.shape[1])
        sub = jax.lax.broadcasted_iota(jnp.int32, x.shape, 1)
        x = jnp.where(sub < valid, x, 0.0)
    acc_ref[...] += jnp.sum(x, axis=1, keepdims=True)

    @pl.when(k == nk - 1)
    def _():
        o_ref[...] = (acc_ref[...] * inv_k).astype(o_ref.dtype)


# --------------------------------------------------------------------------
# Wrappers: tiling + pallas_call construction
# --------------------------------------------------------------------------
def _mean_reduce_last(x2, out_dtype, inv_k):
    """Mean over the last axis of a 2-D array x2 (P, K) -> (P, 1)."""
    P, K = (int(d) for d in x2.shape)
    itemsize = jnp.dtype(x2.dtype).itemsize
    step = max(8, 32 // itemsize)                       # dtype-aware sublane granule
    budget = max(2 * step * 128, _block_bytes() // itemsize)

    if K <= budget // step:
        TK = K                                          # whole reduce axis per block
    else:
        TK = max(128, ((budget // step) // 128) * 128)  # lane-aligned, ~budget/step wide

    tp = budget // max(TK, 1)
    TP = P if tp >= P else max(step, (tp // step) * step)

    pb, kb = _cdiv(P, TP), _cdiv(K, TK)
    # v7x megacore: guarantee >= 2 blocks on the parallel (kept) axis when possible.
    if pb == 1 and P > step:
        TP = min(TP, _round_up(_cdiv(P, 2), step))
        pb = _cdiv(P, TP)

    cost = pl.CostEstimate(
        flops=P * K, transcendentals=0,
        bytes_accessed=P * K * itemsize + P * jnp.dtype(out_dtype).itemsize)
    cparams = pltpu.CompilerParams(
        dimension_semantics=("parallel",) if kb == 1 else ("parallel", "arbitrary"),
        vmem_limit_bytes=_VMEM_LIMIT_BYTES)

    if kb == 1:
        return pl.pallas_call(
            functools.partial(_mean_last_single_kernel, inv_k=inv_k),
            out_shape=jax.ShapeDtypeStruct((P, 1), out_dtype),
            grid_spec=pltpu.PrefetchScalarGridSpec(
                num_scalar_prefetch=0, grid=(pb,),
                in_specs=[pl.BlockSpec((TP, TK), lambda p: (p, 0))],
                out_specs=pl.BlockSpec((TP, 1), lambda p: (p, 0))),
            compiler_params=cparams, cost_estimate=cost,
        )(x2)

    return pl.pallas_call(
        functools.partial(_mean_last_acc_kernel, inv_k=inv_k, rem=K % TK),
        out_shape=jax.ShapeDtypeStruct((P, 1), out_dtype),
        grid_spec=pltpu.PrefetchScalarGridSpec(
            num_scalar_prefetch=0, grid=(pb, kb),
            in_specs=[pl.BlockSpec((TP, TK), lambda p, k: (p, k))],
            out_specs=pl.BlockSpec((TP, 1), lambda p, k: (p, 0)),
            scratch_shapes=[pltpu.VMEM((TP, 1), jnp.float32)]),
        compiler_params=cparams, cost_estimate=cost,
    )(x2)


def _mean_reduce_mid(x3, out_dtype, inv_k):
    """Mean over the middle axis of a 3-D array x3 (P, K, Q) -> (P, 1, Q)."""
    P, K, Q = (int(d) for d in x3.shape)
    itemsize = jnp.dtype(x3.dtype).itemsize
    step = max(8, 32 // itemsize)
    budget = max(2 * step * 128, _block_bytes() // itemsize)

    lane_cap = max(128, ((budget // step) // 128) * 128)
    TQ = Q if Q <= lane_cap else lane_cap               # kept lane axis stays dense

    tk = budget // max(TQ, 1)
    TK = K if tk >= K else max(step, (tk // step) * step)

    tp = budget // max(TK * TQ, 1)
    TP = max(1, min(P, tp))                             # pack several P rows per block

    pb, qb, kb = _cdiv(P, TP), _cdiv(Q, TQ), _cdiv(K, TK)
    # v7x megacore: make sure the parallel extent is >= 2 when the shape allows it.
    if pb * qb == 1:
        if P >= 2:
            TP = _cdiv(P, 2)
            pb = _cdiv(P, TP)
        elif Q > 128:
            TQ = _round_up(_cdiv(Q, 2), 128)
            qb = _cdiv(Q, TQ)

    cost = pl.CostEstimate(
        flops=P * K * Q, transcendentals=0,
        bytes_accessed=P * K * Q * itemsize + P * Q * jnp.dtype(out_dtype).itemsize)
    cparams = pltpu.CompilerParams(
        dimension_semantics=("parallel", "parallel") if kb == 1
        else ("parallel", "parallel", "arbitrary"),
        vmem_limit_bytes=_VMEM_LIMIT_BYTES)

    if kb == 1:
        return pl.pallas_call(
            functools.partial(_mean_mid_single_kernel, inv_k=inv_k),
            out_shape=jax.ShapeDtypeStruct((P, 1, Q), out_dtype),
            grid_spec=pltpu.PrefetchScalarGridSpec(
                num_scalar_prefetch=0, grid=(pb, qb),
                in_specs=[pl.BlockSpec((TP, TK, TQ), lambda p, q: (p, 0, q))],
                out_specs=pl.BlockSpec((TP, 1, TQ), lambda p, q: (p, 0, q))),
            compiler_params=cparams, cost_estimate=cost,
        )(x3)

    return pl.pallas_call(
        functools.partial(_mean_mid_acc_kernel, inv_k=inv_k, rem=K % TK),
        out_shape=jax.ShapeDtypeStruct((P, 1, Q), out_dtype),
        grid_spec=pltpu.PrefetchScalarGridSpec(
            num_scalar_prefetch=0, grid=(pb, qb, kb),
            in_specs=[pl.BlockSpec((TP, TK, TQ), lambda p, q, k: (p, k, q))],
            out_specs=pl.BlockSpec((TP, 1, TQ), lambda p, q, k: (p, 0, q)),
            scratch_shapes=[pltpu.VMEM((TP, 1, TQ), jnp.float32)]),
        compiler_params=cparams, cost_estimate=cost,
    )(x3)


def _mean_contiguous(x, run):
    """Mean over a contiguous run of dims (sorted, adjacent), keepdim=False."""
    ndim = x.ndim
    first, last = run[0], run[-1]
    shape = x.shape
    P = int(np.prod(shape[:first])) if first > 0 else 1
    K = int(np.prod(shape[first:last + 1]))
    Q = int(np.prod(shape[last + 1:])) if last + 1 < ndim else 1
    kept_shape = tuple(shape[d] for d in range(ndim) if d < first or d > last)
    inv_k = 1.0 / float(max(K, 1))
    if Q == 1:
        out = _mean_reduce_last(x.reshape(P, K), x.dtype, inv_k)
    else:
        out = _mean_reduce_mid(x.reshape(P, K, Q), x.dtype, inv_k)
    return out.reshape(kept_shape)


def mean_dim(x, dim):
    """Equivalent of torch.ops.aten.mean.dim(x, dim) (keepdim=False)."""
    x = jnp.asarray(x)
    if not jnp.issubdtype(x.dtype, jnp.floating):
        raise TypeError(
            "mean_dim: only floating-point inputs are supported "
            "(aten.mean.dim rejects integer inputs without an explicit dtype).")

    ndim = x.ndim
    if isinstance(dim, (int, np.integer)):
        dims = (int(dim),)
    else:
        dims = tuple(int(d) for d in dim)
    if not dims:
        dims = tuple(range(ndim))     # aten.mean.dim with dim=[] reduces over all dims
    dims = tuple(sorted(set(d % ndim for d in dims)))

    # Split into contiguous runs; reduce the trailing run with one Pallas call and
    # recurse on the rest (chained means over disjoint dims are exact), so no
    # wrapper-side transpose copy is ever materialized.
    runs = []
    for d in dims:
        if runs and runs[-1][-1] == d - 1:
            runs[-1].append(d)
        else:
            runs.append([d])

    y = _mean_contiguous(x, runs[-1])
    if len(runs) == 1:
        return y
    remaining = tuple(d for run in runs[:-1] for d in run)
    return mean_dim(y, remaining)     # earlier dims' indices are unchanged


# PatternModule.forward(x, dim) maps 1:1 onto mean_dim.
pattern_module_forward = mean_dim


if __name__ == "__main__":
    key = jax.random.PRNGKey(0)
    # Small NCHW-style tensor consistent with the module's usage.
    x = jax.random.normal(key, (2, 4, 16, 16), dtype=jnp.float32)

    # mean over the channel dim (middle-axis reduction path).
    out = jax.block_until_ready(mean_dim(x, 1))
    np.testing.assert_allclose(np.asarray(out), np.asarray(jnp.mean(x, axis=1)),
                               rtol=1e-5, atol=1e-5)

    # mean over spatial dims (trailing / lane-axis reduction path).
    out2 = jax.block_until_ready(mean_dim(x, (2, 3)))
    np.testing.assert_allclose(np.asarray(out2), np.asarray(jnp.mean(x, axis=(2, 3))),
                               rtol=1e-5, atol=1e-5)

    # non-contiguous reduced dims -> chained reductions (no transpose copy).
    x4 = jax.random.normal(jax.random.PRNGKey(1), (2, 3, 4, 5), dtype=jnp.float32)
    out3 = jax.block_until_ready(mean_dim(x4, (1, 3)))
    np.testing.assert_allclose(np.asarray(out3), np.asarray(jnp.mean(x4, axis=(1, 3))),
                               rtol=1e-5, atol=1e-5)

    # full reduction to a scalar.
    out4 = jax.block_until_ready(mean_dim(x, (0, 1, 2, 3)))
    np.testing.assert_allclose(np.asarray(out4), np.asarray(jnp.mean(x)),
                               rtol=1e-5, atol=1e-5)

    # Exercise the multi-K-block accumulator + masked-tail paths with a tiny
    # block budget (keeps the test shapes small while covering the tiled code).
    _FORCE_BLOCK_BYTES = 64 * 1024
    xa = jax.random.normal(jax.random.PRNGKey(2), (10, 5000), dtype=jnp.float32)
    oa = jax.block_until_ready(mean_dim(xa, 1))
    np.testing.assert_allclose(np.asarray(oa), np.asarray(jnp.mean(xa, axis=1)),
                               rtol=1e-5, atol=1e-5)

    xb = jax.random.normal(jax.random.PRNGKey(3), (3, 1000, 160), dtype=jnp.float32)
    ob = jax.block_until_ready(mean_dim(xb, 1))
    np.testing.assert_allclose(np.asarray(ob), np.asarray(jnp.mean(xb, axis=1)),
                               rtol=1e-5, atol=1e-5)
    _FORCE_BLOCK_BYTES = None

    # bf16 path (dtype-aware sublane granule, f32 accumulation, bf16 output).
    xc = jax.random.normal(jax.random.PRNGKey(4), (2, 4, 16, 16), dtype=jnp.bfloat16)
    oc = jax.block_until_ready(mean_dim(xc, 1))
    np.testing.assert_allclose(np.asarray(oc, dtype=np.float32),
                               np.asarray(jnp.mean(xc.astype(jnp.float32), axis=1)),
                               rtol=2e-2, atol=2e-2)

    print("KERNEL_OK")
</pallas_src>

<mosaic_0001>
module attributes {stable_mosaic.version = 11 : i64} {
  func.func @_mean_mid_single_kernel(%arg0: i32, %arg1: i32, %arg2: memref<1x4x256xf32, #tpu.memory_space<vmem>>, %arg3: memref<1x1x256xf32, #tpu.memory_space<vmem>>) attributes {dimension_semantics = [#tpu.dimension_semantics<parallel>, #tpu.dimension_semantics<parallel>], iteration_bounds = array<i64: 2, 1>, scalar_prefetch = 0 : i64, scratch_operands = 0 : i64, tpu.core_type = #tpu.core_type<tc>, window_params = [{transform_indices = @transform_0, window_bounds = array<i64: 1, 4, 256>}, {transform_indices = @transform_1, window_bounds = array<i64: 1, 1, 256>}]} {
    %c0 = arith.constant 0 : index
    %c0_0 = arith.constant 0 : index
    %c0_1 = arith.constant 0 : index
    %0 = vector.load %arg2[%c0, %c0_0, %c0_1] : memref<1x4x256xf32, #tpu.memory_space<vmem>>, vector<1x4x256xf32>
    %cst = arith.constant dense<0.000000e+00> : vector<1x256xf32>
    %1 = vector.multi_reduction <add>, %0, %cst [1] : vector<1x4x256xf32> to vector<1x256xf32>
    %2 = vector.shape_cast %1 : vector<1x256xf32> to vector<1x1x256xf32>
    %cst_2 = arith.constant 2.500000e-01 : f32
    %3 = vector.broadcast %cst_2 : f32 to vector<1x1x256xf32>
    %4 = arith.mulf %2, %3 : vector<1x1x256xf32>
    %c0_3 = arith.constant 0 : index
    %c0_4 = arith.constant 0 : index
    %c0_5 = arith.constant 0 : index
    %5 = vector.load %arg3[%c0_3, %c0_4, %c0_5] : memref<1x1x256xf32, #tpu.memory_space<vmem>>, vector<1x1x256xf32>
    tpu.vector_store %arg3[%c0_3, %c0_4, %c0_5], %4 {strides = array<i32>} : memref<1x1x256xf32, #tpu.memory_space<vmem>>, vector<1x1x256xf32>,
    return
  }
  func.func @transform_0(%arg0: i32, %arg1: i32) -> (i32, i32, i32) {
    %c0_i32 = arith.constant 0 : i32
    %c0_i32_0 = arith.constant 0 : i32
    return %arg0, %c0_i32, %arg1 : i32, i32, i32
  }
  func.func @transform_1(%arg0: i32, %arg1: i32) -> (i32, i32, i32) {
    %c0_i32 = arith.constant 0 : i32
    %c0_i32_0 = arith.constant 0 : i32
    return %arg0, %c0_i32, %arg1 : i32, i32, i32
  }
}

</mosaic_0001>

<bundles_post_ra>
// kernel: tpu_custom_call.1
= control target key start
LH: loop header
LB: loop body
LE: loop exit
PB: predicated region body
PF: predicated region fallthrough
CT: control target
= control target key end

     0   :  { %6 = vsyncpa [#allocation3], 0  ;;  %s679_s0 = inlined_call_operand.hbm [shape: f32[2,4,256], index: 0, kind: input, shape index: {}]   ;;  %s680_s1 = inlined_call_operand.hbm [shape: f32[2,1,256], index: 1, kind: output, shape index: {}]  }
   0x1   :  { %8 = vsyncpa [#allocation3 + $0x1], 0 }
   0x2   :  { %9 = vsyncpa [#allocation4], 0 }
   0x3   :  { %11 = vsyncpa [#allocation4 + $0x1], 0  ;;  %s506_s6 = smov 0   ;;  %s508_s7 = smov 0  }
   0x4   :  { %s510_s8 = smov 0   ;;  %s512_s9 = smov 0  }
   0x5   :  { %s514_s10 = smov 0   ;;  %s516_s11 = smov 0  }
   0x6 LB: > { %s298_s12 = sadd.s32 4294967295, %s491_s11   ;;  %s299_s13 = sadd.s32 4294967294, %s491_s11   ;;  %s491_s11 = sphi %s516_s11, %s17_s11   ;;  %s487_s10 = sphi %s514_s10, %s696_s10   ;;  %s483_s9 = sphi %s512_s9, %s695_s9   ;;  %s479_s8 = sphi %s510_s8, %s694_s8   ;;  %s475_s7 = sphi %s508_s7, %s693_s7   ;;  %s471_s6 = sphi %s506_s6, %s692_s6  }
   0x7   : > { %s29_s14 = sadd.s32 1, %s487_s10  ;;  %s38_s15 = sadd.s32 1, %s479_s8 }
   0x8   : > { %p31_p0 = scmp.ge.s32.totalorder %s29_s14, 2  ;;  %p45_p1 = scmp.ne.s32.totalorder %s479_s8, %s475_s7 }
   0x9   : > { %p46_p2 = scmp.eq.s32.totalorder %s491_s11, 0  ;;  %p51_p3 = scmp.ne.s32.totalorder %s475_s7, %s471_s6 }
   0xa   : > { %s698_s14 = smov (%p31_p0, %s29_s14), 0  ;;  %p52_p5 = scmp.eq.s32.totalorder %s298_s12, 0 }
   0xb   : > { %p547_p4 = por %p46_p2, %p45_p1  ;;  %s33_s17 = ssub.s32 %s487_s10, %s698_s14 }
   0xc   : > { %p77_p6 = scmp.eq.s32.totalorder %s298_s12, 1  ;;  %p36_p7 = scmp.eq.s32.totalorder %s33_s17, 0 }
   0xd   : > { %p553_p8 = por %p52_p5, %p51_p3  ;;  %p83_p10 = scmp.eq.s32.totalorder %s299_s13, 1 }
   0xe   : > { %p557_p9 = por %p77_p6, %p45_p1  ;;  %p327_p13 = scmp.lt.s32.totalorder %s491_s11, 2 }
   0xf   : > { %s562_s20 = scalar_select %p36_p7, %s479_s8, %s38_s15  }
  0x10   : > { %s684_s19 = scalar_select %p557_p9, 1, 0 }
  0x11   : > { %p564_p11 = por %p83_p10, %p51_p3  ;;  %s103_s22 = sand.u32 1, %s479_s8  }
  0x12   : > { %s302_s23 = sshll.u32 %s103_s22, 3  ;;  %s313_s24 = sshll.u32 %s487_s10, 7 }
  0x13   : > { %s685_s21 = scalar_select %p564_p11, 1, 0 }
  0x14   : > { %s575_s27 = scalar_lea.hbm %s679_s0, %s313_s24  ;;  %s107_s28 = scalar_lea.vmem [#allocation2], %s302_s23 }
  0x15   : > { %s117_s29 = sshll.u32 %s107_s28, 4  ;;  %p581_p0 = pnand %p327_p13, %p547_p4  ;;  %s577_s29 = int_to_ptr.vmem [resolvable:$true] %s117_s29 }
  0x16   : > { %s104_s2 = scalar_lea.sflag [#allocation3], %s103_s22  ;;  %s379_s3 = scalar_lea.hbm %s575_s27, 128 }
  0x17   : > { %p380_p3 = scmp.ne.s32.totalorder %s575_s27, %s379_s3  ;;  %p381_p5 = pneg %p581_p0 }
  0x18   : > { %s384_s12 = scalar_lea.hbm %s679_s0, 256  ;;  %p385_p4 = scmp.lt.u32.totalorder %s575_s27, %s679_s0 }
  0x19   : > { %p382_p6 = pnand %p381_p5, %p380_p3  ;;  %p386_p10 = scmp.lt.u32.totalorder %s384_s12, %s379_s3 }
  0x1a   : > { %p388_p12 = scmp.lt.u32.totalorder %s379_s3, %s575_s27 }
  0x1b   : > { %p383_p7 = pneg %p382_p6  ;;  %p387_p13 = por %p386_p10, %p385_p4 }
  0x1d   : > { %p389_p1 = por %p388_p12, %p387_p13 }
  0x1f   : > { %p390_p2 = pnand %p389_p1, %p383_p7 }
  0x21   : > { %393 = shalt.err (!%p390_p2)
}
  0x22   : > { %s394_s16 = scalar_lea.vmem %s577_s29, 128  ;;  %s493_s17 = smov [#allocation2]  }
  0x23   : > { %p395_p3 = scmp.ne.s32.totalorder %s577_s29, %s394_s16  ;;  %s399_s22 = sshll.u32 %s493_s17, 4  ;;  %s400_s22 = int_to_ptr.vmem [resolvable:$false] %s399_s22 }
  0x24   : > { %s401_s23 = scalar_lea.vmem %s400_s22, 256  ;;  %p402_p9 = scmp.lt.s32.totalorder %s577_s29, %s400_s22 }
  0x25   : > { %p397_p6 = pnand %p395_p3, %p381_p5  ;;  %p403_p4 = scmp.lt.s32.totalorder %s401_s23, %s394_s16 }
  0x27   : > { %p398_p11 = pneg %p397_p6  ;;  %p404_p10 = por %p403_p4, %p402_p9 }
  0x29   : > { %p405_p12 = pnand %p404_p10, %p398_p11 }
  0x2b   : > { %408 = shalt.err (!%p405_p12)
}
  0x2c   : > { %322 = dma.hbm_to_vmem [thread:$0]  (!%p581_p0), %s575_s27, 128, %s577_s29, %s104_s2  }
  0x2d   : > { %p687_p1 = scmp.lt.s32.totalorder %s491_s11, 3  ;;  %p688_p2 = scmp.ge.s32.totalorder %s491_s11, 1 }
  0x2f   : > { %p123_p5 = pnand %p688_p2, %p687_p1 }
  0x30   : > { %s617_s24 = sand.u32 (!%p123_p5), 1, %s475_s7  }
  0x31   : > { %126 = sbr.rel (%p123_p5) target bundleno = 95 (0x5f), region = 24  ;;  %s306_s25 = sshll.u32 (!%p123_p5), %s617_s24, 3 }
  0x32   : > { %s129_s26 = scalar_lea.sflag (!%p123_p5), [#allocation3], %s617_s24  ;;  %s132_s28 = scalar_lea.vmem (!%p123_p5), [#allocation2], %s306_s25 }
  0x38   : > { %462 = dma.done.wait (%p553_p8), %s129_s26, 128  }
  0x39   : > { %464 = vsyncadd (%p553_p8), %s129_s26, 4294967168  ;;  %vm157_vm0 = vcmask 1043456   ;;  %v153_v0 = vld [vmem:[%s132_s28] sm:$0xff]  ;;  %v494_v11 = vmov 1966171168   ;;  %v180_v13 = vlaneseq  ;;  %s307_s18 = sshll.u32 %s617_s24, 1 }
  0x3a   : > { %v155_v1 = vcombine.high %v153_v0, %v153_v0  ;;  %v158_v2 = vsel %vm157_vm0, %v153_v0, 0.0  ;;  %v178_v12 = vunpack.c.l.s4 %v494_v11  ;;  %s150_s27 = scalar_lea.vmem [#allocation5], %s307_s18  ;;  %s314_s30 = sshll.u32 %s483_s9, 5 }
  0x3b   : > { %v159_v3 = vrot.slane %v158_v2, 4  ;;  %v181_v19 = vshrl.u32 %v180_v13, 7  ;;  %s214_s29 = sshll.u32 %s150_s27, 4  ;;  %vm194_vm1 = vcmp.lt.s32.totalorder %v180_v13, 256  ;;  %s632_s4 = scalar_lea.hbm %s680_s1, %s314_s30  ;;  %s627_s29 = int_to_ptr.vmem [resolvable:$true] %s214_s29 }
  0x3c   : > { %v165_v4 = vsel %vm157_vm0, %v155_v1, 0.0  ;;  %v179_v18 = vunpack.c.0.s8 %v178_v12  ;;  %s198_s5 = scalar_lea.sflag [#allocation4], %s617_s24  ;;  %s409_s12 = scalar_lea.vmem %s627_s29, 32 }
  0x3d   : > { %v160_v5 = vadd.f32 %v159_v3, %v158_v2  ;;  %v166_v6 = vrot.slane %v165_v4, 4  ;;  %p410_p8 = scmp.ne.s32.totalorder %s627_s29, %s409_s12  ;;  %p689_p9 = scmp.ne.s32.totalorder %s684_s19, 0 }
  0x3e   : > { %v182_v23 = vsub.s32 %v179_v18, %v181_v19  ;;  %s495_s9 = smov [#allocation5]  }
  0x3f   : > { %v161_v7 = vrot.slane %v160_v5, 2  ;;  %v167_v8 = vadd.f32 %v166_v6, %v165_v4  ;;  %p411_p11 = pnand %p410_p8, %p689_p9  ;;  %s413_s13 = sshll.u32 %s495_s9, 4  ;;  %s414_s13 = int_to_ptr.vmem [resolvable:$false] %s413_s13 }
  0x40   : > { %s415_s15 = scalar_lea.vmem %s414_s13, 64  ;;  %p416_p7 = scmp.lt.s32.totalorder %s627_s29, %s414_s13 }
  0x41   : > { %v162_v9 = vadd.f32 %v161_v7, %v160_v5  ;;  %v168_v10 = vrot.slane %v167_v8, 2  ;;  %p412_p0 = pneg %p411_p11  ;;  %p417_p13 = scmp.lt.s32.totalorder %s415_s15, %s409_s12 }
  0x43   : > { %v163_v14 = vrot.slane %v162_v9, 1  ;;  %v169_v15 = vadd.f32 %v168_v10, %v167_v8  ;;  %p418_p3 = por %p417_p13, %p416_p7 }
  0x45   : > { %v164_v16 = vadd.f32 %v163_v14, %v162_v9  ;;  %v170_v17 = vrot.slane %v169_v15, 1  ;;  %p419_p6 = pnand %p418_p3, %p412_p0 }
  0x47   : > { %v171_v20 = vadd.f32 %v170_v17, %v169_v15  ;;  %v172_v21 = vmul.f32 0.25, %v164_v16 }
  0x49   : > { %v173_v22 = vmul.f32 0.25, %v171_v20 }
  0x4b   : > { %v176_v24 = vcombine.low %v172_v21, %v173_v22 }
  0x4d   : > { %v183_v25 = vrot.slane %v176_v24, %v182_v23 }
  0x4f   : > { %v190_v26 = vrot.slane %v183_v25, %v182_v23 }
  0x51   : > { %196 = vst.msk [vmem:[%s150_s27] sm:$0x3] %vm194_vm1, %v190_v26 }
  0x52   : > { %422 = shalt.err (!%p419_p6)
}
  0x53   : > { %s423_s16 = scalar_lea.hbm %s632_s4, 32  ;;  %s427_s23 = scalar_lea.hbm %s680_s1, 64 }
  0x54   : > { %p424_p4 = scmp.ne.s32.totalorder %s632_s4, %s423_s16  ;;  %p428_p1 = scmp.lt.u32.totalorder %s632_s4, %s680_s1 }
  0x55   : > { %p429_p2 = scmp.lt.u32.totalorder %s427_s23, %s423_s16  ;;  %p431_p8 = scmp.lt.u32.totalorder %s423_s16, %s632_s4 }
  0x56   : > { %p425_p10 = pnand %p424_p4, %p689_p9 }
  0x57   : > { %p430_p5 = por %p429_p2, %p428_p1 }
  0x58   : > { %p426_p12 = pneg %p425_p10 }
  0x59   : > { %p432_p11 = por %p431_p8, %p430_p5 }
  0x5b   : > { %p433_p0 = pnand %p432_p11, %p426_p12 }
  0x5d   : > { %436 = shalt.err (!%p433_p0)
}
  0x5e   : > { %317 = dma.vmem_to_hbm [thread:$0]  (%p689_p9), %s627_s29, 32, %s632_s4, %s198_s5  }
  0x5f PF: > { %s226_s26 = sand.u32 1, %s471_s6   ;;  %p690_p7 = scmp.ne.s32.totalorder %s685_s21, 0 }
  0x60   : > { %p691_p13 = scmp.ge.s32.totalorder %s491_s11, 2  ;;  %s227_s28 = scalar_lea.sflag [#allocation4], %s226_s26 }
  0x62   : > { %p324_p3 = pnand %p691_p13, %p690_p7 }
  0x64   : > { %466 = dma.done.wait (!%p324_p3), %s227_s28, 32  }
  0x65   : > { %468 = vsyncadd (!%p324_p3), %s227_s28, 4294967264  ;;  %s17_s11 = sadd.s32 1, %s491_s11   ;;  %s692_s6 = smov %s475_s7 }
  0x66   : > { %p14_p6 = scmp.ge.s32.totalorder %s17_s11, 4   ;;  %s693_s7 = smov %s479_s8 }
  0x67   : > { %s694_s8 = smov %s562_s20  ;;  %s695_s9 = smov %s487_s10 }
  0x68   : > { %s696_s10 = smov %s698_s14  ;;  %16 = sbr.rel (!%p14_p6) target bundleno = 6 (0x6), region = 69 }
  0x6f   :  { %232 = vsyncpa [#allocation3], 1 }
  0x70   :  { %234 = vsyncpa [#allocation3 + $0x1], 1 }
  0x71   :  { %235 = vsyncpa [#allocation4], 1 }
  0x72   :  { %237 = vsyncpa [#allocation4 + $0x1], 1 }

</bundles_post_ra>
